<compile_context>
chip_gen: v6e
topology: v6e:2x2x1
jax: 0.10.0
libtpu: 0.0.40
codegen_flags: <defaults>
</compile_context>

<pallas_src>
import jax
import jax.numpy as jnp
from jax import lax
from jax.experimental import pallas as pl
from jax.experimental.pallas import tpu as pltpu


# ---------------------------------------------------------------------------
# Fused forward kernel: encoder + decoder + adjacency reconstruction
# ---------------------------------------------------------------------------

def _igae_fused_kernel(x_ref, adj_ref,
                       w1_ref, w2_ref, w3_ref, w4_ref, w5_ref, w6_ref,
                       x_hat_ref, adj_out_ref, z_ref):
    f32 = jnp.float32

    x = x_ref[...]
    adj = adj_ref[...]          # loaded once, reused for all 3 encoder layers

    def gnn(h, w, a, activate):
        # out = a @ act(h @ w); act applied BEFORE the adjacency multiply,
        # exactly as in GNNLayer.forward (mm -> tanh -> spmm).
        hw = jnp.dot(h, w, preferred_element_type=f32)
        if activate:
            hw = jnp.tanh(hw)
        return jnp.dot(a, hw, preferred_element_type=f32)

    def gram(h):
        # h @ h.T via dot_general contracting last-with-last: the "transpose"
        # is folded into the MXU operand feed (no XLU vxpose / extra copy).
        return lax.dot_general(h, h, (((1,), (1,)), ((), ())),
                               preferred_element_type=f32)

    # ----- encoder (original adjacency) -----
    h = gnn(x, w1_ref[...], adj, True)
    h = gnn(h, w2_ref[...], adj, True)
    z = gnn(h, w3_ref[...], adj, False)
    adj_enc = jax.nn.sigmoid(gram(z))          # sigmoid(z z^T)

    # ----- decoder (reconstructed adjacency, as in IGAE.forward) -----
    d = gnn(z, w4_ref[...], adj_enc, True)
    d = gnn(d, w5_ref[...], adj_enc, True)
    x_hat = gnn(d, w6_ref[...], adj_enc, True)

    adj_out = adj_enc + jax.nn.sigmoid(gram(x_hat))

    # ----- only the three final outputs ever leave VMEM -----
    x_hat_ref[...] = x_hat.astype(x_hat_ref.dtype)
    adj_out_ref[...] = adj_out.astype(adj_out_ref.dtype)
    z_ref[...] = z.astype(z_ref.dtype)


def igae_forward(params, x, adj):
    """Fused IGAE forward: returns (x_hat, adj_out, z_igae)."""
    n, f_in = x.shape
    enc3 = params["w3"].shape[1]

    def vmem():
        # whole array resident in VMEM, no blocking, no grid / pipeline.
        return pl.BlockSpec(memory_space=pltpu.MemorySpace.VMEM)

    return pl.pallas_call(
        _igae_fused_kernel,
        out_shape=(
            jax.ShapeDtypeStruct((n, f_in), x.dtype),   # x_hat
            jax.ShapeDtypeStruct((n, n), x.dtype),      # adj_out
            jax.ShapeDtypeStruct((n, enc3), x.dtype),   # z_igae
        ),
        in_specs=[vmem() for _ in range(8)],
        out_specs=(vmem(), vmem(), vmem()),
        # TODO(synk): for large N (esp. v7x 64 MiB VMEM), switch to a row-tiled
        # grid with a "parallel" axis instead of whole-array VMEM blocks.
    )(x, adj,
      params["w1"], params["w2"], params["w3"],
      params["w4"], params["w5"], params["w6"])


# ---------------------------------------------------------------------------
# Parameter init (xavier_uniform, same as torch.nn.init.xavier_uniform_)
# ---------------------------------------------------------------------------

def xavier_uniform(key, fan_in, fan_out, dtype=jnp.float32):
    bound = (6.0 / (fan_in + fan_out)) ** 0.5
    return jax.random.uniform(
        key, (fan_in, fan_out), dtype=dtype, minval=-bound, maxval=bound
    )


def init_igae_params(key, n_inputs, enc1, enc2, enc3, dec1, dec2, dec3):
    ks = jax.random.split(key, 6)
    return {
        "w1": xavier_uniform(ks[0], n_inputs, enc1),
        "w2": xavier_uniform(ks[1], enc1, enc2),
        "w3": xavier_uniform(ks[2], enc2, enc3),
        "w4": xavier_uniform(ks[3], dec1, dec2),
        "w5": xavier_uniform(ks[4], dec2, dec3),
        "w6": xavier_uniform(ks[5], dec3, n_inputs),
    }


# ---------------------------------------------------------------------------
# Pure-JAX reference (mirrors the PyTorch module) for a correctness check
# ---------------------------------------------------------------------------

def igae_forward_ref(params, x, adj):
    hi = jax.lax.Precision.HIGHEST

    def gnn(h, w, a, activate):
        hw = jnp.dot(h, w, precision=hi)
        if activate:
            hw = jnp.tanh(hw)
        return jnp.dot(a, hw, precision=hi)

    h = gnn(x, params["w1"], adj, True)
    h = gnn(h, params["w2"], adj, True)
    z = gnn(h, params["w3"], adj, False)
    adj_enc = jax.nn.sigmoid(jnp.dot(z, z.T, precision=hi))
    d = gnn(z, params["w4"], adj_enc, True)
    d = gnn(d, params["w5"], adj_enc, True)
    x_hat = gnn(d, params["w6"], adj_enc, True)
    adj_out = adj_enc + jax.nn.sigmoid(jnp.dot(x_hat, x_hat.T, precision=hi))
    return x_hat, adj_out, z


# ---------------------------------------------------------------------------
# Main
# ---------------------------------------------------------------------------

if __name__ == "__main__":
    N = 16            # number of graph nodes
    n_inputs = 32     # input feature dim
    enc1, enc2, enc3 = 32, 16, 8
    dec1, dec2, dec3 = 8, 16, 32   # dec1 == enc3 (latent dim)

    key = jax.random.PRNGKey(0)
    k_x, k_adj, k_p = jax.random.split(key, 3)

    x = jax.random.normal(k_x, (N, n_inputs), dtype=jnp.float32)

    # Deterministic dense "normalized adjacency": sparse-ish symmetric pattern
    # plus self-loops, row-normalized (torch.spmm semantics == dense matmul).
    a = (jax.random.uniform(k_adj, (N, N)) > 0.7).astype(jnp.float32)
    a = jnp.maximum(a, a.T) + jnp.eye(N, dtype=jnp.float32)
    adj = a / jnp.sum(a, axis=1, keepdims=True)

    params = init_igae_params(k_p, n_inputs, enc1, enc2, enc3,
                              dec1, dec2, dec3)

    x_hat, adj_out, z_igae = igae_forward(params, x, adj)
    jax.block_until_ready((x_hat, adj_out, z_igae))

    assert x_hat.shape == (N, n_inputs)
    assert adj_out.shape == (N, N)
    assert z_igae.shape == (N, enc3)

    # Correctness check vs pure-JAX reference of the PyTorch module.
    xr, ar, zr = igae_forward_ref(params, x, adj)
    assert jnp.allclose(x_hat, xr, atol=2e-3, rtol=2e-3)
    assert jnp.allclose(adj_out, ar, atol=2e-3, rtol=2e-3)
    assert jnp.allclose(z_igae, zr, atol=2e-3, rtol=2e-3)

    print("KERNEL_OK")
</pallas_src>

<mosaic_0001>
module attributes {stable_mosaic.version = 11 : i64} {
  func.func @_igae_fused_kernel(%arg0: memref<16x32xf32, #tpu.memory_space<vmem>>, %arg1: memref<16x16xf32, #tpu.memory_space<vmem>>, %arg2: memref<32x32xf32, #tpu.memory_space<vmem>>, %arg3: memref<32x16xf32, #tpu.memory_space<vmem>>, %arg4: memref<16x8xf32, #tpu.memory_space<vmem>>, %arg5: memref<8x16xf32, #tpu.memory_space<vmem>>, %arg6: memref<16x32xf32, #tpu.memory_space<vmem>>, %arg7: memref<32x32xf32, #tpu.memory_space<vmem>>, %arg8: memref<16x32xf32, #tpu.memory_space<vmem>>, %arg9: memref<16x16xf32, #tpu.memory_space<vmem>>, %arg10: memref<16x8xf32, #tpu.memory_space<vmem>>) attributes {dimension_semantics = [], scalar_prefetch = 0 : i64, scratch_operands = 0 : i64, tpu.core_type = #tpu.core_type<tc>} {
    %c0 = arith.constant 0 : index
    %c0_0 = arith.constant 0 : index
    %0 = vector.load %arg0[%c0, %c0_0] : memref<16x32xf32, #tpu.memory_space<vmem>>, vector<16x32xf32>
    %c0_1 = arith.constant 0 : index
    %c0_2 = arith.constant 0 : index
    %1 = vector.load %arg1[%c0_1, %c0_2] : memref<16x16xf32, #tpu.memory_space<vmem>>, vector<16x16xf32>
    %c0_3 = arith.constant 0 : index
    %c0_4 = arith.constant 0 : index
    %2 = vector.load %arg2[%c0_3, %c0_4] : memref<32x32xf32, #tpu.memory_space<vmem>>, vector<32x32xf32>
    %cst = arith.constant dense<0.000000e+00> : vector<16x32xf32>
    %3 = tpu.matmul %0, %2, %cst {dimension_numbers = #tpu.dot_dimension_numbers<[1], [0], [0], [1], [0, 0, 1, 1], [], []>} : vector<16x32xf32>, vector<32x32xf32>, vector<16x32xf32> -> vector<16x32xf32>
    %4 = math.tanh %3 : vector<16x32xf32>
    %cst_5 = arith.constant dense<0.000000e+00> : vector<16x32xf32>
    %5 = tpu.matmul %1, %4, %cst_5 {dimension_numbers = #tpu.dot_dimension_numbers<[1], [0], [0], [1], [0, 0, 1, 1], [], []>} : vector<16x16xf32>, vector<16x32xf32>, vector<16x32xf32> -> vector<16x32xf32>
    %c0_6 = arith.constant 0 : index
    %c0_7 = arith.constant 0 : index
    %6 = vector.load %arg3[%c0_6, %c0_7] : memref<32x16xf32, #tpu.memory_space<vmem>>, vector<32x16xf32>
    %cst_8 = arith.constant dense<0.000000e+00> : vector<16x16xf32>
    %7 = tpu.matmul %5, %6, %cst_8 {dimension_numbers = #tpu.dot_dimension_numbers<[1], [0], [0], [1], [0, 0, 1, 1], [], []>} : vector<16x32xf32>, vector<32x16xf32>, vector<16x16xf32> -> vector<16x16xf32>
    %8 = math.tanh %7 : vector<16x16xf32>
    %cst_9 = arith.constant dense<0.000000e+00> : vector<16x16xf32>
    %9 = tpu.matmul %1, %8, %cst_9 {dimension_numbers = #tpu.dot_dimension_numbers<[1], [0], [0], [1], [0, 0, 1, 1], [], []>} : vector<16x16xf32>, vector<16x16xf32>, vector<16x16xf32> -> vector<16x16xf32>
    %c0_10 = arith.constant 0 : index
    %c0_11 = arith.constant 0 : index
    %10 = vector.load %arg4[%c0_10, %c0_11] : memref<16x8xf32, #tpu.memory_space<vmem>>, vector<16x8xf32>
    %cst_12 = arith.constant dense<0.000000e+00> : vector<16x8xf32>
    %11 = tpu.matmul %9, %10, %cst_12 {dimension_numbers = #tpu.dot_dimension_numbers<[1], [0], [0], [1], [0, 0, 1, 1], [], []>} : vector<16x16xf32>, vector<16x8xf32>, vector<16x8xf32> -> vector<16x8xf32>
    %cst_13 = arith.constant dense<0.000000e+00> : vector<16x8xf32>
    %12 = tpu.matmul %1, %11, %cst_13 {dimension_numbers = #tpu.dot_dimension_numbers<[1], [0], [0], [1], [0, 0, 1, 1], [], []>} : vector<16x16xf32>, vector<16x8xf32>, vector<16x8xf32> -> vector<16x8xf32>
    %cst_14 = arith.constant dense<0.000000e+00> : vector<16x16xf32>
    %13 = tpu.matmul %12, %12, %cst_14 {dimension_numbers = #tpu.dot_dimension_numbers<[1], [1], [0], [0], [0, 0, 1, 0], [], []>} : vector<16x8xf32>, vector<16x8xf32>, vector<16x16xf32> -> vector<16x16xf32>
    %14 = arith.negf %13 : vector<16x16xf32>
    %15 = math.exp %14 : vector<16x16xf32>
    %cst_15 = arith.constant 1.000000e+00 : f32
    %16 = vector.broadcast %cst_15 : f32 to vector<16x16xf32>
    %17 = arith.addf %16, %15 : vector<16x16xf32>
    %18 = arith.divf %16, %17 : vector<16x16xf32>
    %c0_16 = arith.constant 0 : index
    %c0_17 = arith.constant 0 : index
    %19 = vector.load %arg5[%c0_16, %c0_17] : memref<8x16xf32, #tpu.memory_space<vmem>>, vector<8x16xf32>
    %cst_18 = arith.constant dense<0.000000e+00> : vector<16x16xf32>
    %20 = tpu.matmul %12, %19, %cst_18 {dimension_numbers = #tpu.dot_dimension_numbers<[1], [0], [0], [1], [0, 0, 1, 1], [], []>} : vector<16x8xf32>, vector<8x16xf32>, vector<16x16xf32> -> vector<16x16xf32>
    %21 = math.tanh %20 : vector<16x16xf32>
    %cst_19 = arith.constant dense<0.000000e+00> : vector<16x16xf32>
    %22 = tpu.matmul %18, %21, %cst_19 {dimension_numbers = #tpu.dot_dimension_numbers<[1], [0], [0], [1], [0, 0, 1, 1], [], []>} : vector<16x16xf32>, vector<16x16xf32>, vector<16x16xf32> -> vector<16x16xf32>
    %c0_20 = arith.constant 0 : index
    %c0_21 = arith.constant 0 : index
    %23 = vector.load %arg6[%c0_20, %c0_21] : memref<16x32xf32, #tpu.memory_space<vmem>>, vector<16x32xf32>
    %cst_22 = arith.constant dense<0.000000e+00> : vector<16x32xf32>
    %24 = tpu.matmul %22, %23, %cst_22 {dimension_numbers = #tpu.dot_dimension_numbers<[1], [0], [0], [1], [0, 0, 1, 1], [], []>} : vector<16x16xf32>, vector<16x32xf32>, vector<16x32xf32> -> vector<16x32xf32>
    %25 = math.tanh %24 : vector<16x32xf32>
    %cst_23 = arith.constant dense<0.000000e+00> : vector<16x32xf32>
    %26 = tpu.matmul %18, %25, %cst_23 {dimension_numbers = #tpu.dot_dimension_numbers<[1], [0], [0], [1], [0, 0, 1, 1], [], []>} : vector<16x16xf32>, vector<16x32xf32>, vector<16x32xf32> -> vector<16x32xf32>
    %c0_24 = arith.constant 0 : index
    %c0_25 = arith.constant 0 : index
    %27 = vector.load %arg7[%c0_24, %c0_25] : memref<32x32xf32, #tpu.memory_space<vmem>>, vector<32x32xf32>
    %cst_26 = arith.constant dense<0.000000e+00> : vector<16x32xf32>
    %28 = tpu.matmul %26, %27, %cst_26 {dimension_numbers = #tpu.dot_dimension_numbers<[1], [0], [0], [1], [0, 0, 1, 1], [], []>} : vector<16x32xf32>, vector<32x32xf32>, vector<16x32xf32> -> vector<16x32xf32>
    %29 = math.tanh %28 : vector<16x32xf32>
    %cst_27 = arith.constant dense<0.000000e+00> : vector<16x32xf32>
    %30 = tpu.matmul %18, %29, %cst_27 {dimension_numbers = #tpu.dot_dimension_numbers<[1], [0], [0], [1], [0, 0, 1, 1], [], []>} : vector<16x16xf32>, vector<16x32xf32>, vector<16x32xf32> -> vector<16x32xf32>
    %cst_28 = arith.constant dense<0.000000e+00> : vector<16x16xf32>
    %31 = tpu.matmul %30, %30, %cst_28 {dimension_numbers = #tpu.dot_dimension_numbers<[1], [1], [0], [0], [0, 0, 1, 0], [], []>} : vector<16x32xf32>, vector<16x32xf32>, vector<16x16xf32> -> vector<16x16xf32>
    %32 = arith.negf %31 : vector<16x16xf32>
    %33 = math.exp %32 : vector<16x16xf32>
    %cst_29 = arith.constant 1.000000e+00 : f32
    %34 = vector.broadcast %cst_29 : f32 to vector<16x16xf32>
    %35 = arith.addf %34, %33 : vector<16x16xf32>
    %36 = arith.divf %34, %35 : vector<16x16xf32>
    %37 = arith.addf %18, %36 : vector<16x16xf32>
    %c0_30 = arith.constant 0 : index
    %c0_31 = arith.constant 0 : index
    %38 = vector.load %arg8[%c0_30, %c0_31] : memref<16x32xf32, #tpu.memory_space<vmem>>, vector<16x32xf32>
    tpu.vector_store %arg8[%c0_30, %c0_31], %30 {strides = array<i32>} : memref<16x32xf32, #tpu.memory_space<vmem>>, vector<16x32xf32>,
    %c0_32 = arith.constant 0 : index
    %c0_33 = arith.constant 0 : index
    %39 = vector.load %arg9[%c0_32, %c0_33] : memref<16x16xf32, #tpu.memory_space<vmem>>, vector<16x16xf32>
    tpu.vector_store %arg9[%c0_32, %c0_33], %37 {strides = array<i32>} : memref<16x16xf32, #tpu.memory_space<vmem>>, vector<16x16xf32>,
    %c0_34 = arith.constant 0 : index
    %c0_35 = arith.constant 0 : index
    %40 = vector.load %arg10[%c0_34, %c0_35] : memref<16x8xf32, #tpu.memory_space<vmem>>, vector<16x8xf32>
    tpu.vector_store %arg10[%c0_34, %c0_35], %12 {strides = array<i32>} : memref<16x8xf32, #tpu.memory_space<vmem>>, vector<16x8xf32>,
    return
  }
}

</mosaic_0001>

<bundles_post_ra>
// kernel: tpu_custom_call.1
= control target key start
LH: loop header
LB: loop body
LE: loop exit
PB: predicated region body
PF: predicated region fallthrough
CT: control target
= control target key end

     0   :  { %16 = vsyncpa [#allocation3], 0  ;;  %s1824_s0 = inlined_call_operand.hbm [shape: f32[16,32], index: 0, kind: input, shape index: {}]   ;;  %s1825_s1 = inlined_call_operand.hbm [shape: f32[16,16], index: 1, kind: input, shape index: {}]   ;;  %s1826_s2 = inlined_call_operand.vmem [shape: f32[32,32], index: 2, kind: input, shape index: {}]   ;;  %s1827_s3 = inlined_call_operand.vmem [shape: f32[32,16], index: 3, kind: input, shape index: {}]   ;;  %s1828_s4 = inlined_call_operand.vmem [shape: f32[16,8], index: 4, kind: input, shape index: {}]   ;;  %s1829_s5 = inlined_call_operand.hbm [shape: f32[8,16], index: 5, kind: input, shape index: {}]   ;;  %s1830_s6 = inlined_call_operand.vmem [shape: f32[16,32], index: 6, kind: input, shape index: {}]   ;;  %s1831_s7 = inlined_call_operand.vmem [shape: f32[32,32], index: 7, kind: input, shape index: {}]   ;;  %s1832_s8 = inlined_call_operand.hbm [shape: f32[16,32], index: 8, kind: output, shape index: {0}]   ;;  %s1833_s9 = inlined_call_operand.hbm [shape: f32[16,16], index: 9, kind: output, shape index: {1}]   ;;  %s1834_s10 = inlined_call_operand.vmem [shape: f32[16,8], index: 10, kind: output, shape index: {2}]  }
   0x1   :  { %17 = vsyncpa [#allocation6], 0 }
   0x2   :  { %18 = vsyncpa [#allocation4], 0 }
   0x3   :  { %19 = vsyncpa [#allocation10], 0  ;;  %s1637_s13 = smov [#allocation5]   ;;  %s1638_s15 = smov [#allocation2]  }
   0x4   :  { %s37_s14 = sshll.u32 %s1637_s13, 4  ;;  %s25_s16 = sshll.u32 %s1638_s15, 4  ;;  %s38_s14 = int_to_ptr.vmem [resolvable:$true] %s37_s14  ;;  %s26_s16 = int_to_ptr.vmem [resolvable:$true] %s25_s16 }
   0x5   :  { %s1537_s17 = scalar_lea.vmem %s38_s14, 256  ;;  %p1542_p1 = scmp.lt.s32.totalorder %s38_s14, %s38_s14 }
   0x6   :  { %p1538_p0 = scmp.ne.s32.totalorder %s38_s14, %s1537_s17  ;;  %p1543_p2 = scmp.lt.s32.totalorder %s1537_s17, %s1537_s17 }
   0x8   :  { %p1544_p3 = por %p1543_p2, %p1542_p1 }
   0xa   :  { %p1545_p4 = pnand %p1544_p3, %p1538_p0 }
   0xc   :  { %1548 = shalt.err (!%p1545_p4)
}
   0xd   :  { %s1639_s18 = smov 128   ;;  %s1640_s19 = smov 8  }
   0xe   :  { %43 = dma.hbm_to_vmem [thread:$0]  %s1825_s1, 256, %s38_s14, [#allocation6], %s1639_s18, %s1639_s18, %s1640_s19  }
   0xf   :  { %s1557_s22 = scalar_lea.vmem %s26_s16, 256  ;;  %p1562_p6 = scmp.lt.s32.totalorder %s26_s16, %s26_s16 }
  0x10   :  { %p1558_p5 = scmp.ne.s32.totalorder %s26_s16, %s1557_s22  ;;  %p1563_p7 = scmp.lt.s32.totalorder %s1557_s22, %s1557_s22 }
  0x12   :  { %p1564_p8 = por %p1563_p7, %p1562_p6 }
  0x14   :  { %p1565_p9 = pnand %p1564_p8, %p1558_p5 }
  0x16   :  { %1568 = shalt.err (!%p1565_p9)
}
  0x17   :  { %31 = dma.hbm_to_vmem [thread:$0]  %s1824_s0, 256, %s26_s16, [#allocation3], %s1639_s18, %s1639_s18, %s1640_s19  }
  0x18   :  { %s1641_s25 = smov [#allocation7]  }
  0x19   :  { %s56_s26 = sshll.u32 %s1641_s25, 4  ;;  %s57_s26 = int_to_ptr.vmem [resolvable:$true] %s56_s26 }
  0x1a   :  { %s1577_s27 = scalar_lea.vmem %s57_s26, 128  ;;  %p1582_p11 = scmp.lt.s32.totalorder %s57_s26, %s57_s26 }
  0x1b   :  { %p1578_p10 = scmp.ne.s32.totalorder %s57_s26, %s1577_s27  ;;  %p1583_p12 = scmp.lt.s32.totalorder %s1577_s27, %s1577_s27 }
  0x1d   :  { %p1584_p13 = por %p1583_p12, %p1582_p11 }
  0x1f   :  { %p1585_p0 = pnand %p1584_p13, %p1578_p10 }
  0x21   :  { %1588 = shalt.err (!%p1585_p0)
}
  0x22   :  { %59 = dma.hbm_to_vmem [thread:$0]  %s1829_s5, 128, %s57_s26, [#allocation6]  }
  0x23   :  { %1629 = dma.done.wait [#allocation3], 256  }
  0x24   :  { %1630 = vsyncadd [#allocation3], 4294967040 }
  0x25   :  { %1631 = dma.done.wait [#allocation6], 384  }
  0x26   :  { %1632 = vsyncadd [#allocation6], 4294966912  ;;  %vm81_vm0 = vcmask 261120   ;;  %v80_v0 = vld [vmem:[%s1826_s2 + $0x18] sm:$0xff]  ;;  %v79_v1 = vld [vmem:[%s1826_s2 + $0x10] sm:$0xff]  ;;  %vm165_vm1 = vcmask 130048  }
  0x27   :  { %1378 = vmatprep.subr.mxu0 %v80_v0  ;;  %v73_v2 = vld [vmem:[#allocation2] sm:$0xff]  ;;  %v78_v3 = vld [vmem:[%s1826_s2 + $0x8] sm:$0xff]  ;;  %v75_v6 = vld [vmem:[#allocation5] sm:$0xff]  ;;  %vm567_vm2 = vcmask 64512  }
  0x28   :  { %1379 = vmatpush3.msra.mxu0 %v80_v0  ;;  %1386 = vmatprep.mubr.msk.f32.mxu0 %vm81_vm0, %v73_v2  ;;  %v77_v4 = vld [vmem:[%s1826_s2] sm:$0xff]  ;;  %v74_v5 = vld [vmem:[#allocation2 + $0x8] sm:$0xff]  ;;  %v76_v11 = vld [vmem:[#allocation5 + $0x8] sm:$0xff] }
  0x29   :  { %1380 = vmatprep.subr.mxu0 %v79_v1  ;;  %1393 = vmatprep.mubr.msk.f32.mxu1 %vm165_vm1, %v75_v6  ;;  %v250_v12 = vld [vmem:[%s1827_s3 + $0x18] sm:$0xff]  ;;  %v249_v13 = vld [vmem:[%s1827_s3 + $0x10] sm:$0xff]  ;;  %v248_v14 = vld [vmem:[%s1827_s3 + $0x8] sm:$0xff] }
  0x2a   :  { %1381 = vmatpush3.msra.mxu0 %v79_v1  ;;  %v247_v15 = vld [vmem:[%s1827_s3] sm:$0xff]  ;;  %v410_v22 = vld [vmem:[%s1828_s4 + $0x8] sm:$0xff]  ;;  %v983_v49 = vld [vmem:[%s1831_s7 + $0x18] sm:$0xff] }
  0x2b   :  { %1382 = vmatprep.subr.mxu0 %v78_v3  ;;  %v409_v23 = vld [vmem:[%s1828_s4] sm:$0xff]  ;;  %v821_v45 = vld [vmem:[%s1830_s6 + $0x8] sm:$0xff]  ;;  %v982_v50 = vld [vmem:[%s1831_s7 + $0x10] sm:$0xff] }
  0x2c   :  { %1383 = vmatpush3.msra.mxu0 %v78_v3  ;;  %v661_v28 = vld [vmem:[#allocation7] sm:$0xff]  ;;  %v981_v55 = vld [vmem:[%s1831_s7 + $0x8] sm:$0xff] }
  0x2d   :  { %1384 = vmatprep.subr.mxu0 %v77_v4  ;;  %v820_v46 = vld [vmem:[%s1830_s6] sm:$0xff] }
  0x2e   :  { %1385 = vmatpush3.msra.mxu0 %v77_v4  ;;  %v980_v56 = vld [vmem:[%s1831_s7] sm:$0xff]  ;;  %s1642_s7 = smov [#allocation8]  }
  0x2f   :  { %1387 = vmatmul.mubr.msk.f32.vlgmr.msra.gmra.mxu0 %vm81_vm0, %v74_v5  ;;  %s1248_s16 = sshll.u32 %s1642_s7, 4  ;;  %s1249_s16 = int_to_ptr.vmem [resolvable:$true] %s1248_s16 }
  0x30   :  { %1411 = vmatprep.mubr.msk.f32.mxu0 %vm165_vm1, %v75_v6  ;;  %s1589_s17 = scalar_lea.vmem %s1249_s16, 256  ;;  %p1594_p2 = scmp.lt.s32.totalorder %s1249_s16, %s1249_s16 }
  0x31   :  { %p1590_p1 = scmp.ne.s32.totalorder %s1249_s16, %s1589_s17  ;;  %p1595_p3 = scmp.lt.s32.totalorder %s1589_s17, %s1589_s17 }
  0x33   :  { %p1596_p4 = por %p1595_p3, %p1594_p2 }
  0x35   :  { %p1597_p5 = pnand %p1596_p4, %p1590_p1 }
  0xef   :  { %v1388_v7 = vpop.f32.mrf.mxu0 }
  0xf0   :  { %1493 = vtanh.f32 %v1388_v7 }
  0xf1   :  { %v154_v8 = vpop.f32.mrf.mxu0 }
  0xf2   :  { %1495 = vtanh.f32 %v154_v8 }
  0xfd   :  { %v1494_v9 = vpop.eup %1493 }
  0xfe   :  { %1389 = vmatprep.subr.mxu1 %v1494_v9 }
  0xff   :  { %v1496_v10 = vpop.eup %1495  ;;  %1390 = vmatpush3.msra.mxu1 %v1494_v9 }
 0x100   :  { %1391 = vmatprep.subr.mxu1 %v1496_v10 }
 0x101   :  { %1392 = vmatpush3.msra.mxu1 %v1496_v10 }
 0x102   :  { %1394 = vmatmul.mubr.msk.f32.vlgmr.msra.gmra.mxu1 %vm165_vm1, %v76_v11  ;;  %1396 = vmatprep.subr.mxu1 %v250_v12 }
 0x103   :  { %1397 = vmatpush3.msra.mxu1 %v250_v12 }
 0x104   :  { %1398 = vmatprep.subr.mxu1 %v249_v13 }
 0x105   :  { %1399 = vmatpush3.msra.mxu1 %v249_v13 }
 0x106   :  { %1400 = vmatprep.subr.mxu1 %v248_v14 }
 0x107   :  { %1401 = vmatpush3.msra.mxu1 %v248_v14 }
 0x108   :  { %1402 = vmatprep.subr.mxu1 %v247_v15 }
 0x109   :  { %1403 = vmatpush3.msra.mxu1 %v247_v15 }
 0x1c2   :  { %v1395_v16 = vpop.f32.mrf.mxu1 }
 0x1c4   :  { %v238_v17 = vpop.f32.mrf.mxu1 }
 0x1c5   :  { %1404 = vmatprep.mubr.msk.f32.mxu1 %vm81_vm0, %v238_v17 }
 0x1c6   :  { %1405 = vmatmul.mubr.msk.f32.vlgmr.msra.gmra.mxu1 %vm81_vm0, %v1395_v16 }
 0x1c7   :  { %1425 = vmatprep.mubr.msk.f32.mxu1 %vm165_vm1, %v75_v6 }
 0x286   :  { %v1406_v18 = vpop.f32.mrf.mxu1 }
 0x287   :  { %1497 = vtanh.f32 %v1406_v18 }
 0x288   :  { %v323_v19 = vpop.f32.mrf.mxu1 }
 0x289   :  { %1499 = vtanh.f32 %v323_v19 }
 0x294   :  { %v1498_v20 = vpop.eup %1497 }
 0x295   :  { %1407 = vmatprep.subr.mxu0 %v1498_v20 }
 0x296   :  { %v1500_v21 = vpop.eup %1499  ;;  %1408 = vmatpush3.msra.mxu0 %v1498_v20 }
 0x297   :  { %1409 = vmatprep.subr.mxu0 %v1500_v21 }
 0x298   :  { %1410 = vmatpush3.msra.mxu0 %v1500_v21 }
 0x299   :  { %1412 = vmatmul.mubr.msk.f32.vlgmr.msra.gmra.mxu0 %vm165_vm1, %v76_v11  ;;  %1414 = vmatprep.subr.mxu0 %v410_v22 }
 0x29a   :  { %1415 = vmatpush3.msra.mxu0 %v410_v22 }
 0x29b   :  { %1416 = vmatprep.subr.mxu0 %v409_v23 }
 0x29c   :  { %1417 = vmatpush3.msra.mxu0 %v409_v23 }
 0x359   :  { %v1413_v24 = vpop.f32.mrf.mxu0 }
 0x35b   :  { %v400_v25 = vpop.f32.mrf.mxu0 }
 0x35c   :  { %1418 = vmatprep.mubr.msk.f32.mxu0 %vm165_vm1, %v400_v25 }
 0x35d   :  { %1419 = vmatmul.mubr.msk.f32.vlgmr.msra.gmra.mxu0 %vm165_vm1, %v1413_v24 }
 0x41d   :  { %v1420_v26 = vpop.f32.mrf.mxu0 }
 0x41e   :  { %1421 = vmatprep.subr.mxu1 %v1420_v26 }
 0x41f   :  { %v483_v27 = vpop.f32.mrf.mxu0  ;;  %1422 = vmatpush3.msra.mxu1 %v1420_v26 }
 0x420   :  { %1423 = vmatprep.subr.mxu1 %v483_v27 }
 0x421   :  { %1424 = vmatpush3.msra.mxu1 %v483_v27 }
 0x422   :  { %1426 = vmatmul.mubr.msk.f32.vlgmr.msra.gmra.mxu1 %vm165_vm1, %v76_v11  ;;  %1435 = vmatprep.subr.mxu1 %v661_v28 }
 0x423   :  { %1436 = vmatpush3.msra.mxu1 %v661_v28 }
 0x4e2   :  { %v1427_v29 = vpop.f32.mrf.mxu1 }
 0x4e3   :  { %1242 = vst.msk [vmem:[%s1834_s10 + $0x8] sm:$0xff] %vm567_vm2, %v1427_v29  ;;  %1428 = vmatprep.subr.msk.mxu0 %vm567_vm2, %v1427_v29 }
 0x4e4   :  { %v558_v30 = vpop.f32.mrf.mxu1  ;;  %1429 = vmatpush3.xpose.msk.msra.mxu0 %vm567_vm2, %v1427_v29 }
 0x4e5   :  { %1241 = vst.msk [vmem:[%s1834_s10] sm:$0xff] %vm567_vm2, %v558_v30  ;;  %1430 = vmatprep.subr.msk.mxu0 %vm567_vm2, %v558_v30  ;;  %1432 = vmatprep.mubr.msk.f32.mxu0 %vm567_vm2, %v558_v30 }
 0x4e6   :  { %1437 = vmatprep.mubr.msk.f32.mxu1 %vm567_vm2, %v558_v30 }
 0x4e7   :  { %1438 = vmatmul.mubr.msk.f32.vlgmr.msra.gmra.mxu1 %vm567_vm2, %v1427_v29 }
 0x4e8   :  { %1431 = vmatpush3.xpose.msk.msra.mxu0 %vm567_vm2, %v558_v30 }
 0x4e9   :  { %1447 = vmatprep.subr.mxu0 %v821_v45 }
 0x4eb   :  { %1433 = vmatmul.mubr.msk.f32.vlgmr.msra.gmra.mxu0 %vm567_vm2, %v1427_v29 }
 0x4ec   :  { %1448 = vmatpush3.msra.mxu0 %v821_v45 }
 0x4ed   :  { %1449 = vmatprep.subr.mxu0 %v820_v46 }
 0x4ee   :  { %1450 = vmatpush3.msra.mxu0 %v820_v46 }
 0x4ef   :  { %1461 = vmatprep.subr.mxu0 %v983_v49 }
 0x5a7   :  { %v1439_v31 = vpop.f32.mrf.mxu1 }
 0x5a8   :  { %1501 = vtanh.f32 %v1439_v31 }
 0x5a9   :  { %v728_v32 = vpop.f32.mrf.mxu1 }
 0x5aa   :  { %1503 = vtanh.f32 %v728_v32 }
 0x5ab   :  { %v1434_v33 = vpop.f32.mrf.mxu0 }
 0x5ac   :  { %v1298_v34 = vmul.f32 -1.442695, %v1434_v33 }
 0x5ad   :  { %v640_v35 = vpop.f32.mrf.mxu0 }
 0x5ae   :  { %1505 = vpow2.f32 %v1298_v34  ;;  %v1297_v36 = vmul.f32 -1.442695, %v640_v35 }
 0x5b0   :  { %1507 = vpow2.f32 %v1297_v36 }
 0x5b5   :  { %v1502_v37 = vpop.eup %1501 }
 0x5b6   :  { %1440 = vmatprep.subr.mxu1 %v1502_v37 }
 0x5b7   :  { %v1504_v38 = vpop.eup %1503  ;;  %1441 = vmatpush3.msra.mxu1 %v1502_v37 }
 0x5b8   :  { %1442 = vmatprep.subr.mxu1 %v1504_v38 }
 0x5b9   :  { %1443 = vmatpush3.msra.mxu1 %v1504_v38 }
 0x5bb   :  { %v1506_v39 = vpop.eup %1505 }
 0x5bc   :  { %v656_v41 = vadd.f32 1.0, %v1506_v39 }
 0x5bd   :  { %v1508_v40 = vpop.eup %1507 }
 0x5be   :  { %v655_v42 = vadd.f32 1.0, %v1508_v40 }
 0x5c0   :  { %1509 = vrcp.f32 %v655_v42 }
 0x5c1   :  { %1511 = vrcp.f32 %v656_v41 }
 0x5cd   :  { %v1762_v43 = vpop.eup %1509 }
 0x5ce   :  { %v1764_v44 = vpop.eup %1511  ;;  %1444 = vmatprep.mubr.msk.f32.mxu1 %vm165_vm1, %v1762_v43 }
 0x5cf   :  { %1445 = vmatmul.mubr.msk.f32.vlgmr.msra.gmra.mxu1 %vm165_vm1, %v1764_v44 }
 0x5d0   :  { %1458 = vmatprep.mubr.msk.f32.mxu1 %vm165_vm1, %v1762_v43 }
 0x68f   :  { %v1446_v47 = vpop.f32.mrf.mxu1 }
 0x691   :  { %v811_v48 = vpop.f32.mrf.mxu1 }
 0x692   :  { %1451 = vmatprep.mubr.msk.f32.mxu0 %vm165_vm1, %v811_v48 }
 0x693   :  { %1452 = vmatmul.mubr.msk.f32.vlgmr.msra.gmra.mxu0 %vm165_vm1, %v1446_v47 }
 0x694   :  { %1462 = vmatpush3.msra.mxu0 %v983_v49 }
 0x695   :  { %1463 = vmatprep.subr.mxu0 %v982_v50 }
 0x696   :  { %1464 = vmatpush3.msra.mxu0 %v982_v50 }
 0x697   :  { %1465 = vmatprep.subr.mxu0 %v981_v55 }
 0x698   :  { %1466 = vmatpush3.msra.mxu0 %v981_v55 }
 0x699   :  { %1467 = vmatprep.subr.mxu0 %v980_v56 }
 0x69a   :  { %1468 = vmatpush3.msra.mxu0 %v980_v56 }
 0x753   :  { %v1453_v51 = vpop.f32.mrf.mxu0 }
 0x754   :  { %1513 = vtanh.f32 %v1453_v51 }
 0x755   :  { %v894_v52 = vpop.f32.mrf.mxu0 }
 0x756   :  { %1515 = vtanh.f32 %v894_v52 }
 0x761   :  { %v1514_v53 = vpop.eup %1513 }
 0x762   :  { %1454 = vmatprep.subr.mxu1 %v1514_v53 }
 0x763   :  { %v1516_v54 = vpop.eup %1515  ;;  %1455 = vmatpush3.msra.mxu1 %v1514_v53 }
 0x764   :  { %1456 = vmatprep.subr.mxu1 %v1516_v54 }
 0x765   :  { %1457 = vmatpush3.msra.mxu1 %v1516_v54 }
 0x766   :  { %1459 = vmatmul.mubr.msk.f32.vlgmr.msra.gmra.mxu1 %vm165_vm1, %v1764_v44 }
 0x767   :  { %1476 = vmatprep.mubr.msk.f32.mxu1 %vm165_vm1, %v1762_v43 }
 0x826   :  { %v1460_v57 = vpop.f32.mrf.mxu1 }
 0x828   :  { %v971_v58 = vpop.f32.mrf.mxu1 }
 0x829   :  { %1469 = vmatprep.mubr.msk.f32.mxu0 %vm81_vm0, %v971_v58 }
 0x82a   :  { %1470 = vmatmul.mubr.msk.f32.vlgmr.msra.gmra.mxu0 %vm81_vm0, %v1460_v57 }
 0x8ea   :  { %v1471_v59 = vpop.f32.mrf.mxu0 }
 0x8eb   :  { %1517 = vtanh.f32 %v1471_v59 }
 0x8ec   :  { %v1056_v60 = vpop.f32.mrf.mxu0 }
 0x8ed   :  { %1519 = vtanh.f32 %v1056_v60 }
 0x8f8   :  { %v1518_v61 = vpop.eup %1517 }
 0x8f9   :  { %1472 = vmatprep.subr.mxu1 %v1518_v61 }
 0x8fa   :  { %v1520_v62 = vpop.eup %1519  ;;  %1473 = vmatpush3.msra.mxu1 %v1518_v61 }
 0x8fb   :  { %1474 = vmatprep.subr.mxu1 %v1520_v62 }
 0x8fc   :  { %1475 = vmatpush3.msra.mxu1 %v1520_v62 }
 0x8fd   :  { %1477 = vmatmul.mubr.msk.f32.vlgmr.msra.gmra.mxu1 %vm165_vm1, %v1764_v44 }
 0x9bd   :  { %v1478_v63 = vpop.f32.mrf.mxu1 }
 0x9be   :  { %1238 = vst.msk [vmem:[#allocation8 + $0x8] sm:$0xff] %vm81_vm0, %v1478_v63  ;;  %1479 = vmatprep.subr.msk.mxu1 %vm81_vm0, %v1478_v63 }
 0x9bf   :  { %v1133_v0 = vpop.f32.mrf.mxu1  ;;  %1480 = vmatpush3.xpose.msk.msra.mxu1 %vm81_vm0, %v1478_v63 }
 0x9c0   :  { %1237 = vst.msk [vmem:[#allocation8] sm:$0xff] %vm81_vm0, %v1133_v0  ;;  %1481 = vmatprep.subr.msk.mxu1 %vm81_vm0, %v1133_v0  ;;  %1483 = vmatprep.mubr.msk.f32.mxu1 %vm81_vm0, %v1133_v0 }
 0x9c3   :  { %1482 = vmatpush3.xpose.msk.msra.mxu1 %vm81_vm0, %v1133_v0 }
 0x9c6   :  { %1484 = vmatmul.mubr.msk.f32.vlgmr.msra.gmra.mxu1 %vm81_vm0, %v1478_v63 }
 0x9c7   :  { %1600 = shalt.err (!%p1597_p5)
}
 0x9c8   :  { %1254 = dma.vmem_to_hbm [thread:$0]  %s1249_s16, 256, %s1832_s8, [#allocation4], %s1639_s18, %s1639_s18, %s1640_s19  }
 0x9c9   :  { %s1643_s22 = smov [#allocation9]  }
 0x9ca   :  { %s1260_s23 = sshll.u32 %s1643_s22, 4  ;;  %s1261_s23 = int_to_ptr.vmem [resolvable:$true] %s1260_s23 }
 0x9cb   :  { %s1609_s8 = scalar_lea.vmem %s1261_s23, 256  ;;  %p1614_p7 = scmp.lt.s32.totalorder %s1261_s23, %s1261_s23 }
 0x9cc   :  { %p1610_p6 = scmp.ne.s32.totalorder %s1261_s23, %s1609_s8  ;;  %p1615_p8 = scmp.lt.s32.totalorder %s1609_s8, %s1609_s8 }
 0x9ce   :  { %p1616_p9 = por %p1615_p8, %p1614_p7 }
 0x9d0   :  { %p1617_p10 = pnand %p1616_p9, %p1610_p6 }
 0xa86   :  { %v1485_v1 = vpop.f32.mrf.mxu1 }
 0xa87   :  { %v1316_v2 = vmul.f32 -1.442695, %v1485_v1 }
 0xa88   :  { %v1214_v3 = vpop.f32.mrf.mxu1 }
 0xa89   :  { %1521 = vpow2.f32 %v1316_v2  ;;  %v1315_v4 = vmul.f32 -1.442695, %v1214_v3 }
 0xa8b   :  { %1523 = vpow2.f32 %v1315_v4 }
 0xa96   :  { %v1522_v5 = vpop.eup %1521 }
 0xa97   :  { %v1230_v6 = vadd.f32 1.0, %v1522_v5 }
 0xa98   :  { %v1524_v7 = vpop.eup %1523 }
 0xa99   :  { %1525 = vrcp.f32 %v1230_v6  ;;  %v1229_v8 = vadd.f32 1.0, %v1524_v7 }
 0xa9b   :  { %1527 = vrcp.f32 %v1229_v8 }
 0xaa6   :  { %v1526_v9 = vpop.eup %1525 }
 0xaa7   :  { %v1236_v10 = vadd.f32 %v1526_v9, %v1764_v44 }
 0xaa8   :  { %v1528_v11 = vpop.eup %1527 }
 0xaa9   :  { %v1235_v12 = vadd.f32 %v1528_v11, %v1762_v43  ;;  %1240 = vst.msk [vmem:[#allocation9 + $0x8] sm:$0xff] %vm165_vm1, %v1236_v10 }
 0xaab   :  { %1239 = vst.msk [vmem:[#allocation9] sm:$0xff] %vm165_vm1, %v1235_v12 }
 0xaac   :  { %1620 = shalt.err (!%p1617_p10)
}
 0xaad   :  { %1266 = dma.vmem_to_hbm [thread:$0]  %s1261_s23, 256, %s1833_s9, [#allocation10], %s1639_s18, %s1639_s18, %s1640_s19  }
 0xaae   :  { %1633 = dma.done.wait [#allocation4], 256  }
 0xaaf   :  { %1634 = vsyncadd [#allocation4], 4294967040 }
 0xab0   :  { %1635 = dma.done.wait [#allocation10], 256  }
 0xab1   :  { %1636 = vsyncadd [#allocation10], 4294967040 }
 0xab2   :  { %1277 = vsyncpa [#allocation3], 1 }
 0xab3   :  { %1278 = vsyncpa [#allocation6], 1 }
 0xab4   :  { %1279 = vsyncpa [#allocation4], 1 }
 0xab5   :  { %1280 = vsyncpa [#allocation10], 1 }

</bundles_post_ra>
